<compile_context>
chip_gen: v6e
topology: v6e:2x2x1
jax: 0.10.0
libtpu: 0.0.40
codegen_flags: <defaults>
</compile_context>

<pallas_src>
import jax
import jax.numpy as jnp
from jax.experimental import pallas as pl
from jax.experimental.pallas import tpu as pltpu


def lstm_peephole_kernel(z_ref, c_ref, wz_ref, b_ref, v_ref, h_out_ref, c_out_ref):
    H = c_ref.shape[-1]

    z = z_ref[...]                                    # (tm, I+H)
    c = c_ref[...].astype(jnp.float32)                # (tm, H)

    # Single fused MXU matmul for all 4 gates + single broadcast bias add.
    pre = jnp.dot(z, wz_ref[...], preferred_element_type=jnp.float32) + b_ref[...]  # (tm, 4H)

    # Hoisted peephole rows (loaded once each).
    v_f = v_ref[0:1, :].astype(jnp.float32)           # (1, H)
    v_i = v_ref[1:2, :].astype(jnp.float32)
    v_o = v_ref[2:3, :].astype(jnp.float32)

    f_t = jax.nn.sigmoid(pre[:, 0 * H:1 * H] + v_f * c)
    i_t = jax.nn.sigmoid(pre[:, 1 * H:2 * H] + v_i * c)
    g_t = jnp.tanh(pre[:, 2 * H:3 * H])
    c_new = f_t * c + i_t * g_t
    o_t = jax.nn.sigmoid(pre[:, 3 * H:4 * H] + v_o * c_new)
    h_new = o_t * jnp.tanh(c_new)

    h_out_ref[...] = h_new.astype(h_out_ref.dtype)
    c_out_ref[...] = c_new.astype(c_out_ref.dtype)


def lstm_cell_with_peephole(x, h_t, c_t, U, W, V, b, *, matmul_dtype=None, block_b=None):
    """Single peephole-LSTM cell step.

    x: (B, I), h_t/c_t: (B, H)
    U: (4, I, H), W: (4, H, H)   gate order [f, i, c, o]
    V: (3, H)                    rows [f, i, o]
    b: (4, H)                    gate order [f, i, c, o]
    matmul_dtype: optionally cast the fused matmul operands (e.g. jnp.bfloat16
                  on v6e/v7x); gate math / state stay f32.
    """
    B, I = x.shape
    _, H = h_t.shape
    out_dtype = x.dtype

    # ---- Fused weight layout (done once in the wrapper, cheap XLA ops) ----
    Uf = jnp.transpose(U, (1, 0, 2)).reshape(I, 4 * H)   # (I, 4H)
    Wf = jnp.transpose(W, (1, 0, 2)).reshape(H, 4 * H)   # (H, 4H)
    Wz = jnp.concatenate([Uf, Wf], axis=0)               # (I+H, 4H)
    bf = b.reshape(1, 4 * H)                              # (1, 4H)
    z = jnp.concatenate([x, h_t], axis=-1)                # (B, I+H)

    if matmul_dtype is not None:
        z = z.astype(matmul_dtype)
        Wz = Wz.astype(matmul_dtype)

    # ---- Batch tiling (parallel grid axis) ----
    if block_b is None:
        block_b = B
        if B > 256:
            for cand in (256, 128, 64, 32, 16, 8):
                if B % cand == 0:
                    block_b = cand
                    break
    grid = (B // block_b,)

    # ---- VMEM budget / compiler params ----
    zb = jnp.dtype(z.dtype).itemsize
    block_bytes = (
        block_b * (I + H) * zb          # z tile
        + (I + H) * 4 * H * zb          # fused weights (resident)
        + block_b * H * 4               # c tile (f32)
        + (4 * H + 3 * H) * 4           # bias + peephole rows
        + 2 * block_b * H * 4           # outputs
    )
    vmem_limit = None
    if 3 * block_bytes > (32 << 20):    # above default scoped VMEM -> raise, cap at v7x 64 MiB
        vmem_limit = min(int(3 * block_bytes), 64 << 20)
    compiler_params = pltpu.CompilerParams(
        dimension_semantics=("parallel",),
        vmem_limit_bytes=vmem_limit,
    )

    cost = pl.CostEstimate(
        flops=int(2 * B * (I + H) * 4 * H),
        transcendentals=int(5 * B * H),
        bytes_accessed=int(
            B * (I + H) * zb + (I + H) * 4 * H * zb
            + B * H * 4 + 7 * H * 4 + 2 * B * H * 4
        ),
    )

    h_new, c_new = pl.pallas_call(
        lstm_peephole_kernel,
        out_shape=(jax.ShapeDtypeStruct((B, H), out_dtype),
                   jax.ShapeDtypeStruct((B, H), out_dtype)),
        grid=grid,
        in_specs=[
            pl.BlockSpec((block_b, I + H), lambda i: (i, 0)),   # z tile (per batch block)
            pl.BlockSpec((block_b, H), lambda i: (i, 0)),       # c tile
            pl.BlockSpec((I + H, 4 * H), lambda i: (0, 0)),     # fused weights, VMEM-resident
            pl.BlockSpec((1, 4 * H), lambda i: (0, 0)),         # fused bias
            pl.BlockSpec((3, H), lambda i: (0, 0)),             # peephole rows [f, i, o]
        ],
        out_specs=[
            pl.BlockSpec((block_b, H), lambda i: (i, 0)),
            pl.BlockSpec((block_b, H), lambda i: (i, 0)),
        ],
        compiler_params=compiler_params,
        cost_estimate=cost,
    )(z, c_t, Wz, bf, V)
    return h_new, c_new


def init_params(key, input_sz, hidden_sz, dtype=jnp.float32):
    """Mirrors the PyTorch module init: xavier_normal_ for 2-D weights,
    zeros for 1-D (V_* and b_*)."""
    keys = jax.random.split(key, 8)

    def xavier(k, shape):
        fan_in, fan_out = shape
        std = (2.0 / (fan_in + fan_out)) ** 0.5
        return (std * jax.random.normal(k, shape)).astype(dtype)

    # gate order [f, i, c, o]
    U = jnp.stack([xavier(keys[0], (input_sz, hidden_sz)),
                   xavier(keys[1], (input_sz, hidden_sz)),
                   xavier(keys[2], (input_sz, hidden_sz)),
                   xavier(keys[3], (input_sz, hidden_sz))])
    W = jnp.stack([xavier(keys[4], (hidden_sz, hidden_sz)),
                   xavier(keys[5], (hidden_sz, hidden_sz)),
                   xavier(keys[6], (hidden_sz, hidden_sz)),
                   xavier(keys[7], (hidden_sz, hidden_sz))])
    V = jnp.zeros((3, hidden_sz), dtype)   # rows [f, i, o]
    b = jnp.zeros((4, hidden_sz), dtype)   # gate order [f, i, c, o]
    return U, W, V, b


def reference_forward(x, h_t, c_t, U, W, V, b):
    """Pure-JAX reference matching the PyTorch forward exactly."""
    f_t = jax.nn.sigmoid(x @ U[0] + h_t @ W[0] + b[0] + V[0] * c_t)
    i_t = jax.nn.sigmoid(x @ U[1] + h_t @ W[1] + b[1] + V[1] * c_t)
    c_n = f_t * c_t + i_t * jnp.tanh(x @ U[2] + h_t @ W[2] + b[2])
    o_t = jax.nn.sigmoid(x @ U[3] + h_t @ W[3] + b[3] + V[2] * c_n)
    h_n = o_t * jnp.tanh(c_n)
    return h_n, c_n


if __name__ == "__main__":
    B, INPUT_SZ, HIDDEN_SZ = 8, 16, 32
    key = jax.random.PRNGKey(0)
    k_x, k_h, k_c, k_p, k_v, k_b = jax.random.split(key, 6)

    x = jax.random.normal(k_x, (B, INPUT_SZ), jnp.float32)
    h0 = jax.random.normal(k_h, (B, HIDDEN_SZ), jnp.float32)
    c0 = jax.random.normal(k_c, (B, HIDDEN_SZ), jnp.float32)

    U, W, V, b = init_params(k_p, INPUT_SZ, HIDDEN_SZ)
    # PyTorch init zeros V/b; perturb them here so the peephole + bias paths
    # are actually exercised by the numerical check (reference gets the same values).
    V = 0.1 * jax.random.normal(k_v, V.shape, jnp.float32)
    b = 0.1 * jax.random.normal(k_b, b.shape, jnp.float32)

    h1, c1 = lstm_cell_with_peephole(x, h0, c0, U, W, V, b)
    jax.block_until_ready((h1, c1))

    h_ref, c_ref = reference_forward(x, h0, c0, U, W, V, b)
    assert jnp.allclose(h1, h_ref, atol=1e-5, rtol=1e-5), "h mismatch"
    assert jnp.allclose(c1, c_ref, atol=1e-5, rtol=1e-5), "c mismatch"

    print("KERNEL_OK")
</pallas_src>

<mosaic_0001>
module attributes {stable_mosaic.version = 11 : i64} {
  func.func @lstm_peephole_kernel(%arg0: i32, %arg1: memref<8x48xf32, #tpu.memory_space<vmem>>, %arg2: memref<8x32xf32, #tpu.memory_space<vmem>>, %arg3: memref<48x128xf32, #tpu.memory_space<vmem>>, %arg4: memref<1x128xf32, #tpu.memory_space<vmem>>, %arg5: memref<3x32xf32, #tpu.memory_space<vmem>>, %arg6: memref<8x32xf32, #tpu.memory_space<vmem>>, %arg7: memref<8x32xf32, #tpu.memory_space<vmem>>) attributes {dimension_semantics = [#tpu.dimension_semantics<parallel>], iteration_bounds = array<i64: 1>, scalar_prefetch = 0 : i64, scratch_operands = 0 : i64, tpu.core_type = #tpu.core_type<tc>, window_params = [{transform_indices = @transform_0, window_bounds = array<i64: 8, 48>}, {transform_indices = @transform_1, window_bounds = array<i64: 8, 32>}, {pipeline_mode = #tpu.pipeline_mode<synchronous>, transform_indices = @transform_2, window_bounds = array<i64: 48, 128>}, {pipeline_mode = #tpu.pipeline_mode<synchronous>, transform_indices = @transform_3, window_bounds = array<i64: 1, 128>}, {pipeline_mode = #tpu.pipeline_mode<synchronous>, transform_indices = @transform_4, window_bounds = array<i64: 3, 32>}, {transform_indices = @transform_5, window_bounds = array<i64: 8, 32>}, {transform_indices = @transform_6, window_bounds = array<i64: 8, 32>}]} {
    %c0 = arith.constant 0 : index
    %c0_0 = arith.constant 0 : index
    %0 = vector.load %arg1[%c0, %c0_0] : memref<8x48xf32, #tpu.memory_space<vmem>>, vector<8x48xf32>
    %c0_1 = arith.constant 0 : index
    %c0_2 = arith.constant 0 : index
    %1 = vector.load %arg2[%c0_1, %c0_2] : memref<8x32xf32, #tpu.memory_space<vmem>>, vector<8x32xf32>
    %c0_3 = arith.constant 0 : index
    %c0_4 = arith.constant 0 : index
    %2 = vector.load %arg3[%c0_3, %c0_4] : memref<48x128xf32, #tpu.memory_space<vmem>>, vector<48x128xf32>
    %cst = arith.constant dense<0.000000e+00> : vector<8x128xf32>
    %3 = tpu.matmul %0, %2, %cst {dimension_numbers = #tpu.dot_dimension_numbers<[1], [0], [0], [1], [0, 0, 1, 1], [], []>} : vector<8x48xf32>, vector<48x128xf32>, vector<8x128xf32> -> vector<8x128xf32>
    %c0_5 = arith.constant 0 : index
    %c0_6 = arith.constant 0 : index
    %4 = vector.load %arg4[%c0_5, %c0_6] : memref<1x128xf32, #tpu.memory_space<vmem>>, vector<1x128xf32>
    %5 = vector.broadcast %4 : vector<1x128xf32> to vector<8x128xf32>
    %6 = arith.addf %3, %5 : vector<8x128xf32>
    %c0_7 = arith.constant 0 : index
    %c0_8 = arith.constant 0 : index
    %7 = vector.load %arg5[%c0_7, %c0_8] : memref<3x32xf32, #tpu.memory_space<vmem>>, vector<1x32xf32>
    %c1 = arith.constant 1 : index
    %c0_9 = arith.constant 0 : index
    %8 = vector.load %arg5[%c1, %c0_9] : memref<3x32xf32, #tpu.memory_space<vmem>>, vector<1x32xf32>
    %c2 = arith.constant 2 : index
    %c0_10 = arith.constant 0 : index
    %9 = vector.load %arg5[%c2, %c0_10] : memref<3x32xf32, #tpu.memory_space<vmem>>, vector<1x32xf32>
    %10 = vector.extract_strided_slice %6 {offsets = [0, 0], sizes = [8, 32], strides = [1, 1]} : vector<8x128xf32> to vector<8x32xf32>
    %11 = vector.broadcast %7 : vector<1x32xf32> to vector<8x32xf32>
    %12 = arith.mulf %11, %1 : vector<8x32xf32>
    %13 = arith.addf %10, %12 : vector<8x32xf32>
    %14 = arith.negf %13 : vector<8x32xf32>
    %15 = math.exp %14 : vector<8x32xf32>
    %cst_11 = arith.constant 1.000000e+00 : f32
    %16 = vector.broadcast %cst_11 : f32 to vector<8x32xf32>
    %17 = arith.addf %16, %15 : vector<8x32xf32>
    %18 = arith.divf %16, %17 : vector<8x32xf32>
    %19 = vector.extract_strided_slice %6 {offsets = [0, 32], sizes = [8, 32], strides = [1, 1]} : vector<8x128xf32> to vector<8x32xf32>
    %20 = vector.broadcast %8 : vector<1x32xf32> to vector<8x32xf32>
    %21 = arith.mulf %20, %1 : vector<8x32xf32>
    %22 = arith.addf %19, %21 : vector<8x32xf32>
    %23 = arith.negf %22 : vector<8x32xf32>
    %24 = math.exp %23 : vector<8x32xf32>
    %cst_12 = arith.constant 1.000000e+00 : f32
    %25 = vector.broadcast %cst_12 : f32 to vector<8x32xf32>
    %26 = arith.addf %25, %24 : vector<8x32xf32>
    %27 = arith.divf %25, %26 : vector<8x32xf32>
    %28 = vector.extract_strided_slice %6 {offsets = [0, 64], sizes = [8, 32], strides = [1, 1]} : vector<8x128xf32> to vector<8x32xf32>
    %29 = math.tanh %28 : vector<8x32xf32>
    %30 = arith.mulf %18, %1 : vector<8x32xf32>
    %31 = arith.mulf %27, %29 : vector<8x32xf32>
    %32 = arith.addf %30, %31 : vector<8x32xf32>
    %33 = vector.extract_strided_slice %6 {offsets = [0, 96], sizes = [8, 32], strides = [1, 1]} : vector<8x128xf32> to vector<8x32xf32>
    %34 = vector.broadcast %9 : vector<1x32xf32> to vector<8x32xf32>
    %35 = arith.mulf %34, %32 : vector<8x32xf32>
    %36 = arith.addf %33, %35 : vector<8x32xf32>
    %37 = arith.negf %36 : vector<8x32xf32>
    %38 = math.exp %37 : vector<8x32xf32>
    %cst_13 = arith.constant 1.000000e+00 : f32
    %39 = vector.broadcast %cst_13 : f32 to vector<8x32xf32>
    %40 = arith.addf %39, %38 : vector<8x32xf32>
    %41 = arith.divf %39, %40 : vector<8x32xf32>
    %42 = math.tanh %32 : vector<8x32xf32>
    %43 = arith.mulf %41, %42 : vector<8x32xf32>
    %c0_14 = arith.constant 0 : index
    %c0_15 = arith.constant 0 : index
    %44 = vector.load %arg6[%c0_14, %c0_15] : memref<8x32xf32, #tpu.memory_space<vmem>>, vector<8x32xf32>
    tpu.vector_store %arg6[%c0_14, %c0_15], %43 {strides = array<i32>} : memref<8x32xf32, #tpu.memory_space<vmem>>, vector<8x32xf32>,
    %c0_16 = arith.constant 0 : index
    %c0_17 = arith.constant 0 : index
    %45 = vector.load %arg7[%c0_16, %c0_17] : memref<8x32xf32, #tpu.memory_space<vmem>>, vector<8x32xf32>
    tpu.vector_store %arg7[%c0_16, %c0_17], %32 {strides = array<i32>} : memref<8x32xf32, #tpu.memory_space<vmem>>, vector<8x32xf32>,
    return
  }
  func.func @transform_0(%arg0: i32) -> (i32, i32) {
    %c0_i32 = arith.constant 0 : i32
    %c0_i32_0 = arith.constant 0 : i32
    return %arg0, %c0_i32 : i32, i32
  }
  func.func @transform_1(%arg0: i32) -> (i32, i32) {
    %c0_i32 = arith.constant 0 : i32
    %c0_i32_0 = arith.constant 0 : i32
    return %arg0, %c0_i32 : i32, i32
  }
  func.func @transform_2(%arg0: i32) -> (i32, i32) {
    %c0_i32 = arith.constant 0 : i32
    %c0_i32_0 = arith.constant 0 : i32
    %c0_i32_1 = arith.constant 0 : i32
    return %c0_i32, %c0_i32_0 : i32, i32
  }
  func.func @transform_3(%arg0: i32) -> (i32, i32) {
    %c0_i32 = arith.constant 0 : i32
    %c0_i32_0 = arith.constant 0 : i32
    %c0_i32_1 = arith.constant 0 : i32
    return %c0_i32, %c0_i32_0 : i32, i32
  }
  func.func @transform_4(%arg0: i32) -> (i32, i32) {
    %c0_i32 = arith.constant 0 : i32
    %c0_i32_0 = arith.constant 0 : i32
    %c0_i32_1 = arith.constant 0 : i32
    return %c0_i32, %c0_i32_0 : i32, i32
  }
  func.func @transform_5(%arg0: i32) -> (i32, i32) {
    %c0_i32 = arith.constant 0 : i32
    %c0_i32_0 = arith.constant 0 : i32
    return %arg0, %c0_i32 : i32, i32
  }
  func.func @transform_6(%arg0: i32) -> (i32, i32) {
    %c0_i32 = arith.constant 0 : i32
    %c0_i32_0 = arith.constant 0 : i32
    return %arg0, %c0_i32 : i32, i32
  }
}

</mosaic_0001>

<bundles_post_ra>
// kernel: tpu_custom_call.1
= control target key start
LH: loop header
LB: loop body
LE: loop exit
PB: predicated region body
PF: predicated region fallthrough
CT: control target
= control target key end

     0   :  { %12 = vsyncpa [#allocation3], 0  ;;  %s498_s0 = inlined_call_operand.hbm [shape: f32[8,48], index: 0, kind: input, shape index: {}]   ;;  %s499_s1 = inlined_call_operand.hbm [shape: f32[8,32], index: 1, kind: input, shape index: {}]   ;;  %s500_s2 = inlined_call_operand.hbm [shape: f32[48,128], index: 2, kind: input, shape index: {}]   ;;  %s501_s3 = inlined_call_operand.vmem [shape: f32[1,128], index: 3, kind: input, shape index: {}]   ;;  %s502_s4 = inlined_call_operand.vmem [shape: f32[3,32], index: 4, kind: input, shape index: {}]   ;;  %s503_s5 = inlined_call_operand.hbm [shape: f32[8,32], index: 5, kind: output, shape index: {0}]   ;;  %s504_s6 = inlined_call_operand.hbm [shape: f32[8,32], index: 6, kind: output, shape index: {1}]  }
   0x1   :  { %13 = vsyncpa [#allocation6], 0 }
   0x2   :  { %14 = vsyncpa [#allocation4], 0 }
   0x3   :  { %15 = vsyncpa [#allocation10], 0  ;;  %s417_s21 = smov [#allocation5]   ;;  %s418_s23 = smov [#allocation2]  }
   0x4   :  { %s32_s22 = sshll.u32 %s417_s21, 4  ;;  %s22_s24 = sshll.u32 %s418_s23, 4  ;;  %s33_s22 = int_to_ptr.vmem [resolvable:$true] %s32_s22  ;;  %s23_s24 = int_to_ptr.vmem [resolvable:$true] %s22_s24 }
   0x5   :  { %s317_s25 = scalar_lea.vmem %s33_s22, 128  ;;  %p322_p1 = scmp.lt.s32.totalorder %s33_s22, %s33_s22 }
   0x6   :  { %p318_p0 = scmp.ne.s32.totalorder %s33_s22, %s317_s25  ;;  %p323_p2 = scmp.lt.s32.totalorder %s317_s25, %s317_s25 }
   0x8   :  { %p324_p3 = por %p323_p2, %p322_p1 }
   0xa   :  { %p325_p4 = pnand %p324_p3, %p318_p0 }
   0xc   :  { %328 = shalt.err (!%p325_p4)
}
   0xd   :  { %35 = dma.hbm_to_vmem [thread:$0]  %s499_s1, 128, %s33_s22, [#allocation6]  }
   0xe   :  { %s337_s28 = scalar_lea.vmem %s23_s24, 128  ;;  %p342_p6 = scmp.lt.s32.totalorder %s23_s24, %s23_s24 }
   0xf   :  { %p338_p5 = scmp.ne.s32.totalorder %s23_s24, %s337_s28  ;;  %p343_p7 = scmp.lt.s32.totalorder %s337_s28, %s337_s28 }
  0x11   :  { %p344_p8 = por %p343_p7, %p342_p6 }
  0x13   :  { %p345_p9 = pnand %p344_p8, %p338_p5 }
  0x15   :  { %348 = shalt.err (!%p345_p9)
}
  0x16   :  { %25 = dma.hbm_to_vmem [thread:$0]  %s498_s0, 128, %s23_s24, [#allocation3]  }
  0x17   :  { %s419_s7 = smov [#allocation7]  }
  0x18   :  { %s41_s8 = sshll.u32 %s419_s7, 4  ;;  %s42_s8 = int_to_ptr.vmem [resolvable:$true] %s41_s8 }
  0x19   :  { %s357_s9 = scalar_lea.vmem %s42_s8, 768  ;;  %p362_p11 = scmp.lt.s32.totalorder %s42_s8, %s42_s8 }
  0x1a   :  { %p358_p10 = scmp.ne.s32.totalorder %s42_s8, %s357_s9  ;;  %p363_p12 = scmp.lt.s32.totalorder %s357_s9, %s357_s9 }
  0x1c   :  { %p364_p13 = por %p363_p12, %p362_p11 }
  0x1e   :  { %p365_p0 = pnand %p364_p13, %p358_p10 }
  0x20   :  { %368 = shalt.err (!%p365_p0)
}
  0x21   :  { %s420_s1 = smov 128   ;;  %s421_s10 = smov 8  }
  0x22   :  { %47 = dma.hbm_to_vmem [thread:$0]  %s500_s2, 768, %s42_s8, [#allocation6], %s420_s1, %s420_s1, %s421_s10  }
  0x23   :  { %409 = dma.done.wait [#allocation3], 128  }
  0x24   :  { %410 = vsyncadd [#allocation3], 4294967168 }
  0x25   :  { %411 = dma.done.wait [#allocation6], 896  }
  0x26   :  { %412 = vsyncadd [#allocation6], 4294966400  ;;  %v422_v0 = vmov 0.0   ;;  %vm423_vm0 = vmmov 0   ;;  %v68_v1 = vld [vmem:[#allocation7 + $0x28] sm:$0xff]  ;;  %v67_v2 = vld [vmem:[#allocation7 + $0x20] sm:$0xff] }
  0x27   :  { %267 = vmatprep.subr.mxu0 %v422_v0  ;;  %279 = vmatprep.mubr.msk.f32.mxu0 %vm423_vm0, %v422_v0  ;;  %v66_v3 = vld [vmem:[#allocation7 + $0x18] sm:$0xff]  ;;  %v256_v5 = vld [vmem:[%s502_s4 + $0x1] ss:$0 sm:$0xff]  ;;  %v64_v8 = vld [vmem:[#allocation7 + $0x8] sm:$0xff]  ;;  %s424_s2 = smov 32   ;;  %vm76_vm1 = vcmask 392192  }
  0x28   :  { %268 = vmatpush3.msra.mxu0 %v68_v1  ;;  %v62_v4 = vld [vmem:[#allocation5] sm:$0xff]  ;;  %v65_v6 = vld [vmem:[#allocation7 + $0x10] sm:$0xff]  ;;  %v63_v9 = vld [vmem:[#allocation7] sm:$0xff]  ;;  %s425_s16 = smov 96   ;;  %vm219_vm2 = vcmask 261120   ;;  %s426_s20 = smov [#allocation9]  }
  0x29   :  { %269 = vmatprep.subr.mxu0 %v422_v0  ;;  %v169_v7 = vmul.f32 %v256_v5, %v62_v4  ;;  %v61_v10 = vld [vmem:[#allocation2] sm:$0xff] }
  0x2a   :  { %270 = vmatpush3.msra.mxu0 %v67_v2  ;;  %v252_v11 = vld [vmem:[%s501_s3] ss:$0 sm:$0xff]  ;;  %v258_v33 = vld [vmem:[%s502_s4 + $0x2] ss:$0 sm:$0xff] }
  0x2b   :  { %271 = vmatprep.subr.mxu0 %v422_v0  ;;  %171 = vrot.lane.b32.xlu0 %v169_v7, %s424_s2  ;;  %v254_v24 = vld [vmem:[%s502_s4] ss:$0 sm:$0xff]  ;;  %s238_s4 = sshll.u32 %s426_s20, 4  ;;  %s239_s4 = int_to_ptr.vmem [resolvable:$true] %s238_s4 }
  0x2c   :  { %272 = vmatpush3.msra.mxu0 %v66_v3  ;;  %v157_v25 = vmul.f32 %v254_v24, %v62_v4  ;;  %s369_s21 = scalar_lea.vmem %s239_s4, 128  ;;  %p374_p2 = scmp.lt.s32.totalorder %s239_s4, %s239_s4 }
  0x2d   :  { %273 = vmatprep.subr.mxu0 %v422_v0  ;;  %p370_p1 = scmp.ne.s32.totalorder %s239_s4, %s369_s21  ;;  %p375_p3 = scmp.lt.s32.totalorder %s369_s21, %s369_s21 }
  0x2e   :  { %274 = vmatpush3.msra.mxu0 %v65_v6 }
  0x2f   :  { %275 = vmatprep.subr.mxu0 %v422_v0  ;;  %p376_p4 = por %p375_p3, %p374_p2 }
  0x30   :  { %276 = vmatpush3.msra.mxu0 %v64_v8 }
  0x31   :  { %277 = vmatprep.subr.mxu0 %v422_v0  ;;  %p377_p5 = pnand %p376_p4, %p370_p1 }
  0x32   :  { %278 = vmatpush3.msra.mxu0 %v63_v9 }
  0x33   :  { %280 = vmatmul.mubr.msk.f32.vlgmr.msra.gmra.mxu0 %vm76_vm1, %v61_v10 }
  0x9d   :  { %v172_v16 = vpop.permute.xlu0 %171 }
  0xf3   :  { %v146_v12 = vpop.f32.mrf.mxu0 }
  0xf4   :  { %v147_v13 = vadd.f32 %v252_v11, %v146_v12 }
  0xf5   :  { %v281_v14 = vpop.f32.mrf.mxu0 }
  0xf6   :  { %293 = vtanh.f32 %v147_v13  ;;  %v174_v17 = vadd.f32 %v172_v16, %v147_v13  ;;  %v158_v26 = vadd.f32 %v157_v25, %v147_v13 }
  0xf8   :  { %v257_v18 = vmul.f32 -1.442695, %v174_v17  ;;  %v255_v27 = vmul.f32 -1.442695, %v158_v26 }
  0xfa   :  { %295 = vpow2.f32 %v257_v18 }
 0x103   :  { %v294_v15 = vpop.eup %293 }
 0x104   :  { %184 = vrot.lane.b32.xlu0 %v294_v15, %s425_s16 }
 0x107   :  { %v296_v19 = vpop.eup %295 }
 0x108   :  { %v178_v20 = vadd.f32 1.0, %v296_v19 }
 0x10a   :  { %297 = vrcp.f32 %v178_v20 }
 0x10b   :  { %299 = vpow2.f32 %v255_v27 }
 0x117   :  { %v298_v21 = vpop.eup %297 }
 0x118   :  { %v300_v28 = vpop.eup %299 }
 0x119   :  { %v162_v29 = vadd.f32 1.0, %v300_v28 }
 0x11b   :  { %301 = vrcp.f32 %v162_v29 }
 0x128   :  { %v302_v30 = vpop.eup %301 }
 0x129   :  { %v182_v31 = vmul.f32 %v302_v30, %v62_v4 }
 0x176   :  { %v185_v22 = vpop.permute.xlu0 %184 }
 0x177   :  { %v187_v23 = vmul.f32 %v298_v21, %v185_v22 }
 0x179   :  { %189 = vrot.lane.b32.xlu1 %v187_v23, %s425_s16 }
 0x1eb   :  { %v190_v32 = vpop.permute.xlu1 %189 }
 0x1ec   :  { %v192_v34 = vadd.f32 %v190_v32, %v182_v31 }
 0x1ee   :  { %303 = vtanh.f32 %v192_v34  ;;  %v197_v35 = vmul.f32 %v258_v33, %v192_v34  ;;  %221 = vst.msk [vmem:[#allocation9] sm:$0xff] %vm219_vm2, %v192_v34 }
 0x1f0   :  { %199 = vrot.lane.b32.xlu1 %v197_v35, %s425_s16 }
 0x1fb   :  { %v304_v36 = vpop.eup %303 }
 0x1fc   :  { %211 = vrot.lane.b32.xlu0 %v304_v36, %s425_s16 }
 0x262   :  { %v200_v37 = vpop.permute.xlu1 %199 }
 0x263   :  { %v202_v38 = vadd.f32 %v200_v37, %v147_v13 }
 0x265   :  { %v259_v39 = vmul.f32 -1.442695, %v202_v38 }
 0x267   :  { %305 = vpow2.f32 %v259_v39 }
 0x274   :  { %v306_v40 = vpop.eup %305 }
 0x275   :  { %v206_v41 = vadd.f32 1.0, %v306_v40 }
 0x277   :  { %307 = vrcp.f32 %v206_v41 }
 0x278   :  { %380 = shalt.err (!%p377_p5)
}
 0x279   :  { %241 = dma.vmem_to_hbm [thread:$0]  %s239_s4, 128, %s504_s6, [#allocation10]   ;;  %v212_v43 = vpop.permute.xlu0 %211 }
 0x27a   :  { %s427_s24 = smov [#allocation8]  }
 0x27b   :  { %s228_s25 = sshll.u32 %s427_s24, 4  ;;  %s229_s25 = int_to_ptr.vmem [resolvable:$true] %s228_s25 }
 0x27c   :  { %s389_s26 = scalar_lea.vmem %s229_s25, 128  ;;  %p394_p7 = scmp.lt.s32.totalorder %s229_s25, %s229_s25 }
 0x27d   :  { %p390_p6 = scmp.ne.s32.totalorder %s229_s25, %s389_s26  ;;  %p395_p8 = scmp.lt.s32.totalorder %s389_s26, %s389_s26 }
 0x27f   :  { %p396_p9 = por %p395_p8, %p394_p7 }
 0x281   :  { %p397_p10 = pnand %p396_p9, %p390_p6 }
 0x284   :  { %v308_v42 = vpop.eup %307 }
 0x285   :  { %v214_v44 = vmul.f32 %v308_v42, %v212_v43 }
 0x287   :  { %216 = vrot.lane.b32.xlu1 %v214_v44, %s424_s2 }
 0x2f9   :  { %v217_v45 = vpop.permute.xlu1 %216 }
 0x2fa   :  { %220 = vst.msk [vmem:[#allocation8] sm:$0xff] %vm219_vm2, %v217_v45 }
 0x2fb   :  { %400 = shalt.err (!%p397_p10)
}
 0x2fc   :  { %231 = dma.vmem_to_hbm [thread:$0]  %s229_s25, 128, %s503_s5, [#allocation4]  }
 0x2fd   :  { %413 = dma.done.wait [#allocation4], 128  }
 0x2fe   :  { %414 = vsyncadd [#allocation4], 4294967168 }
 0x2ff   :  { %415 = dma.done.wait [#allocation10], 128  }
 0x300   :  { %416 = vsyncadd [#allocation10], 4294967168 }
 0x301   :  { %248 = vsyncpa [#allocation3], 1 }
 0x302   :  { %249 = vsyncpa [#allocation6], 1 }
 0x303   :  { %250 = vsyncpa [#allocation4], 1 }
 0x304   :  { %251 = vsyncpa [#allocation10], 1 }

</bundles_post_ra>
